<compile_context>
chip_gen: v6e
topology: v6e:2x2x1
jax: 0.10.0
libtpu: 0.0.40
codegen_flags: <defaults>
</compile_context>

<pallas_src>
import functools

import jax
import jax.numpy as jnp
from jax.experimental import pallas as pl
from jax.experimental.pallas import tpu as pltpu


def _round_up(x, m):
    return ((x + m - 1) // m) * m


def _largest_divisor_leq(n, cap):
    """Largest divisor of n that is <= cap (cap is small, <= a few hundred)."""
    cap = max(1, min(n, cap))
    for d in range(cap, 0, -1):
        if n % d == 0:
            return d
    return 1


def mlp_kernel(x_ref, w1_ref, b1_ref, w2_ref, b2_ref, o_ref):
    # fc1: [TM, K] @ [K, H_pad] + [1, H_pad]   (f32 accumulate on the MXU)
    h = jnp.dot(x_ref[...], w1_ref[...], preferred_element_type=jnp.float32)
    h = h + b1_ref[...].astype(jnp.float32)
    # Sigmoid on the EUP slot, kept in f32 for all chip generations.
    h = jax.nn.sigmoid(h)
    # fc2: [TM, H_pad] @ [H_pad, O] + [1, O]
    y = jnp.dot(h.astype(w2_ref.dtype), w2_ref[...],
                preferred_element_type=jnp.float32)
    y = y + b2_ref[...].astype(jnp.float32)
    # Store the unpadded [TM, O] tile (masked vst accepted; HBM bytes ~O/128
    # of the previous padded store).
    o_ref[...] = y.astype(o_ref.dtype)


@functools.partial(jax.jit, static_argnames=("block_m", "use_bf16_inputs"))
def net_forward(x, w1, b1, w2, b2, *, block_m=2048, use_bf16_inputs=False):
    """x: [B, in]; w1: [in, hidden]; b1: [1, hidden];
    w2: [hidden, out]; b2: [1, out]  ->  [B, out]"""
    B, K = x.shape
    H = w1.shape[1]
    O = w2.shape[1]

    out_dtype = x.dtype
    sub = 16 if use_bf16_inputs else 8   # sublane granularity per dtype

    # --- batch tiling: avoid padding B; ensure >=2 grid steps when possible --
    if B % sub == 0:
        B_p = B
        n_units = B // sub
        cap_d = max(1, block_m // sub)
        if n_units >= 2:
            # Cap TM at ~B/2 so grid >= 2 steps -> both v7x TensorCores busy.
            cap_d = min(cap_d, n_units // 2)
        TM = sub * _largest_divisor_leq(n_units, cap_d)
    else:
        TM = min(_round_up(B, sub), max(sub, (block_m // sub) * sub))
        B_p = _round_up(B, TM)

    # --- lane-dense hidden dim (weights only; output stays unpadded) --------
    H_p = _round_up(H, 128)

    if use_bf16_inputs:
        # bf16 MXU operands (v6e/v7x fast path); accumulation stays f32.
        x = x.astype(jnp.bfloat16)
        w1 = w1.astype(jnp.bfloat16)
        w2 = w2.astype(jnp.bfloat16)

    x_p = x if B_p == B else jnp.pad(x, ((0, B_p - B), (0, 0)))
    w1_p = jnp.pad(w1, ((0, 0), (0, H_p - H)))
    b1_p = jnp.pad(b1, ((0, 0), (0, H_p - H)))
    # Zero rows in w2 for the padded hidden columns kill the sigmoid(0)=0.5
    # contribution from padding -> identical math to the unpadded model.
    w2_p = jnp.pad(w2, ((0, H_p - H), (0, 0)))
    b2_p = b2

    grid = (B_p // TM,)

    # --- VMEM budget: real working set + headroom, capped well below 64 MiB --
    def nbytes(shape, dt):
        n = 1
        for s in shape:
            n *= s
        return n * jnp.dtype(dt).itemsize

    vmem_need = (2 * nbytes((TM, K), x_p.dtype)           # x tile, double-buffered
                 + 2 * nbytes((TM, O), out_dtype)          # out tile, double-buffered
                 + 2 * (nbytes((K, H_p), w1_p.dtype) + nbytes((1, H_p), b1_p.dtype)
                        + nbytes((H_p, O), w2_p.dtype) + nbytes((1, O), b2_p.dtype))
                 + 4 * nbytes((TM, H_p), jnp.float32))     # compute intermediates
    vmem_limit = int(min(48 * 1024 * 1024,
                         max(8 * 1024 * 1024, 2 * vmem_need)))

    flops = 2 * B_p * K * H_p + 2 * B_p * H_p * O
    bytes_accessed = (nbytes((B_p, K), x_p.dtype) + nbytes((B_p, O), out_dtype)
                      + nbytes((K, H_p), w1_p.dtype) + nbytes((1, H_p), b1_p.dtype)
                      + nbytes((H_p, O), w2_p.dtype) + nbytes((1, O), b2_p.dtype))

    out = pl.pallas_call(
        mlp_kernel,
        out_shape=jax.ShapeDtypeStruct((B_p, O), out_dtype),
        grid_spec=pltpu.PrefetchScalarGridSpec(
            num_scalar_prefetch=0,
            grid=grid,
            in_specs=[
                # x tile marches over the batch; K == full array dim (legal,
                # intentionally NOT padded to 128 -> no 8x read amplification).
                pl.BlockSpec((TM, K), lambda i: (i, 0)),
                # Weights / biases: constant index -> VMEM-resident across steps.
                pl.BlockSpec((K, H_p), lambda i: (0, 0)),
                pl.BlockSpec((1, H_p), lambda i: (0, 0)),
                pl.BlockSpec((H_p, O), lambda i: (0, 0)),
                pl.BlockSpec((1, O), lambda i: (0, 0)),
            ],
            # Unpadded output: last dim O equals the full array dim (legal).
            out_specs=pl.BlockSpec((TM, O), lambda i: (i, 0)),
        ),
        compiler_params=pltpu.CompilerParams(
            # Batch tiles are independent -> megacore sharding on v7x.
            dimension_semantics=("parallel",),
            vmem_limit_bytes=vmem_limit,
        ),
        cost_estimate=pl.CostEstimate(
            flops=flops,
            transcendentals=B_p * H_p,
            bytes_accessed=bytes_accessed,
        ),
    )(x_p, w1_p, b1_p, w2_p, b2_p)

    # Only slice if we actually padded the batch (pure layout plumbing).
    return out if B_p == B else out[:B]


def init_params(key, input_size, hidden_size, num_out, dtype=jnp.float32):
    """Deterministic init mimicking nn.Linear's U(-1/sqrt(fan_in), +1/sqrt(fan_in))."""
    k1, k2, k3, k4 = jax.random.split(key, 4)
    bound1 = 1.0 / (input_size ** 0.5)
    bound2 = 1.0 / (hidden_size ** 0.5)
    w1 = jax.random.uniform(k1, (input_size, hidden_size), dtype, -bound1, bound1)
    b1 = jax.random.uniform(k2, (1, hidden_size), dtype, -bound1, bound1)
    w2 = jax.random.uniform(k3, (hidden_size, num_out), dtype, -bound2, bound2)
    b2 = jax.random.uniform(k4, (1, num_out), dtype, -bound2, bound2)
    return w1, b1, w2, b2


if __name__ == "__main__":
    # Small shapes consistent with the module: Net(input_size=16, hidden_size=32, num_out=8)
    batch, input_size, hidden_size, num_out = 8, 16, 32, 8

    key = jax.random.PRNGKey(0)
    kx, kp = jax.random.split(key)
    x = jax.random.normal(kx, (batch, input_size), jnp.float32)
    w1, b1, w2, b2 = init_params(kp, input_size, hidden_size, num_out)

    out = net_forward(x, w1, b1, w2, b2)
    jax.block_until_ready(out)

    # Pure-JAX reference of the same math.
    ref = jax.nn.sigmoid(x @ w1 + b1) @ w2 + b2
    assert out.shape == (batch, num_out)
    assert jnp.allclose(out, ref, atol=1e-5, rtol=1e-5)

    # NOTE: use_bf16_inputs=True intentionally changes MXU operand numerics;
    # compare against a bf16 reference / looser tolerance for that path.
    print("KERNEL_OK")
</pallas_src>

<mosaic_0001>
module attributes {stable_mosaic.version = 11 : i64} {
  func.func @mlp_kernel(%arg0: i32, %arg1: memref<8x16xf32, #tpu.memory_space<vmem>>, %arg2: memref<16x128xf32, #tpu.memory_space<vmem>>, %arg3: memref<1x128xf32, #tpu.memory_space<vmem>>, %arg4: memref<128x8xf32, #tpu.memory_space<vmem>>, %arg5: memref<1x8xf32, #tpu.memory_space<vmem>>, %arg6: memref<8x8xf32, #tpu.memory_space<vmem>>) attributes {dimension_semantics = [#tpu.dimension_semantics<parallel>], iteration_bounds = array<i64: 1>, scalar_prefetch = 0 : i64, scratch_operands = 0 : i64, tpu.core_type = #tpu.core_type<tc>, window_params = [{transform_indices = @transform_0, window_bounds = array<i64: 8, 16>}, {pipeline_mode = #tpu.pipeline_mode<synchronous>, transform_indices = @transform_1, window_bounds = array<i64: 16, 128>}, {pipeline_mode = #tpu.pipeline_mode<synchronous>, transform_indices = @transform_2, window_bounds = array<i64: 1, 128>}, {pipeline_mode = #tpu.pipeline_mode<synchronous>, transform_indices = @transform_3, window_bounds = array<i64: 128, 8>}, {pipeline_mode = #tpu.pipeline_mode<synchronous>, transform_indices = @transform_4, window_bounds = array<i64: 1, 8>}, {transform_indices = @transform_5, window_bounds = array<i64: 8, 8>}]} {
    %c0 = arith.constant 0 : index
    %c0_0 = arith.constant 0 : index
    %0 = vector.load %arg1[%c0, %c0_0] : memref<8x16xf32, #tpu.memory_space<vmem>>, vector<8x16xf32>
    %c0_1 = arith.constant 0 : index
    %c0_2 = arith.constant 0 : index
    %1 = vector.load %arg2[%c0_1, %c0_2] : memref<16x128xf32, #tpu.memory_space<vmem>>, vector<16x128xf32>
    %cst = arith.constant dense<0.000000e+00> : vector<8x128xf32>
    %2 = tpu.matmul %0, %1, %cst {dimension_numbers = #tpu.dot_dimension_numbers<[1], [0], [0], [1], [0, 0, 1, 1], [], []>} : vector<8x16xf32>, vector<16x128xf32>, vector<8x128xf32> -> vector<8x128xf32>
    %c0_3 = arith.constant 0 : index
    %c0_4 = arith.constant 0 : index
    %3 = vector.load %arg3[%c0_3, %c0_4] : memref<1x128xf32, #tpu.memory_space<vmem>>, vector<1x128xf32>
    %4 = vector.broadcast %3 : vector<1x128xf32> to vector<8x128xf32>
    %5 = arith.addf %2, %4 : vector<8x128xf32>
    %6 = arith.negf %5 : vector<8x128xf32>
    %7 = math.exp %6 : vector<8x128xf32>
    %cst_5 = arith.constant 1.000000e+00 : f32
    %8 = vector.broadcast %cst_5 : f32 to vector<8x128xf32>
    %9 = arith.addf %8, %7 : vector<8x128xf32>
    %10 = arith.divf %8, %9 : vector<8x128xf32>
    %c0_6 = arith.constant 0 : index
    %c0_7 = arith.constant 0 : index
    %11 = vector.load %arg4[%c0_6, %c0_7] : memref<128x8xf32, #tpu.memory_space<vmem>>, vector<128x8xf32>
    %cst_8 = arith.constant dense<0.000000e+00> : vector<8x8xf32>
    %12 = tpu.matmul %10, %11, %cst_8 {dimension_numbers = #tpu.dot_dimension_numbers<[1], [0], [0], [1], [0, 0, 1, 1], [], []>} : vector<8x128xf32>, vector<128x8xf32>, vector<8x8xf32> -> vector<8x8xf32>
    %c0_9 = arith.constant 0 : index
    %c0_10 = arith.constant 0 : index
    %13 = vector.load %arg5[%c0_9, %c0_10] : memref<1x8xf32, #tpu.memory_space<vmem>>, vector<1x8xf32>
    %14 = vector.broadcast %13 : vector<1x8xf32> to vector<8x8xf32>
    %15 = arith.addf %12, %14 : vector<8x8xf32>
    %c0_11 = arith.constant 0 : index
    %c0_12 = arith.constant 0 : index
    %16 = vector.load %arg6[%c0_11, %c0_12] : memref<8x8xf32, #tpu.memory_space<vmem>>, vector<8x8xf32>
    tpu.vector_store %arg6[%c0_11, %c0_12], %15 {strides = array<i32>} : memref<8x8xf32, #tpu.memory_space<vmem>>, vector<8x8xf32>,
    return
  }
  func.func @transform_0(%arg0: i32) -> (i32, i32) {
    %c0_i32 = arith.constant 0 : i32
    %c0_i32_0 = arith.constant 0 : i32
    return %arg0, %c0_i32 : i32, i32
  }
  func.func @transform_1(%arg0: i32) -> (i32, i32) {
    %c0_i32 = arith.constant 0 : i32
    %c0_i32_0 = arith.constant 0 : i32
    %c0_i32_1 = arith.constant 0 : i32
    return %c0_i32, %c0_i32_0 : i32, i32
  }
  func.func @transform_2(%arg0: i32) -> (i32, i32) {
    %c0_i32 = arith.constant 0 : i32
    %c0_i32_0 = arith.constant 0 : i32
    %c0_i32_1 = arith.constant 0 : i32
    return %c0_i32, %c0_i32_0 : i32, i32
  }
  func.func @transform_3(%arg0: i32) -> (i32, i32) {
    %c0_i32 = arith.constant 0 : i32
    %c0_i32_0 = arith.constant 0 : i32
    %c0_i32_1 = arith.constant 0 : i32
    return %c0_i32, %c0_i32_0 : i32, i32
  }
  func.func @transform_4(%arg0: i32) -> (i32, i32) {
    %c0_i32 = arith.constant 0 : i32
    %c0_i32_0 = arith.constant 0 : i32
    %c0_i32_1 = arith.constant 0 : i32
    return %c0_i32, %c0_i32_0 : i32, i32
  }
  func.func @transform_5(%arg0: i32) -> (i32, i32) {
    %c0_i32 = arith.constant 0 : i32
    %c0_i32_0 = arith.constant 0 : i32
    return %arg0, %c0_i32 : i32, i32
  }
}

</mosaic_0001>

<bundles_post_ra>
// kernel: net_forward.1
= control target key start
LH: loop header
LB: loop body
LE: loop exit
PB: predicated region body
PF: predicated region fallthrough
CT: control target
= control target key end

     0   :  { %v315_v1 = vmov 0.0   ;;  %vm316_vm0 = vmmov 0   ;;  %s414_s0 = inlined_call_operand.vmem [shape: f32[8,16], index: 0, kind: input, shape index: {}]   ;;  %s415_s1 = inlined_call_operand.vmem [shape: f32[16,128], index: 1, kind: input, shape index: {}]   ;;  %s416_s2 = inlined_call_operand.vmem [shape: f32[1,128], index: 2, kind: input, shape index: {}]   ;;  %s417_s3 = inlined_call_operand.vmem [shape: f32[128,8], index: 3, kind: input, shape index: {}]   ;;  %s418_s4 = inlined_call_operand.vmem [shape: f32[1,8], index: 4, kind: input, shape index: {}]   ;;  %s419_s5 = inlined_call_operand.hbm [shape: f32[8,8], index: 5, kind: output, shape index: {}]  }
   0x1   :  { %v23_v0 = vld [vmem:[%s415_s1 + $0x8] sm:$0xff]  ;;  %244 = vmatprep.subr.mxu0 %v315_v1  ;;  %v22_v2 = vld [vmem:[%s415_s1] sm:$0xff]  ;;  %248 = vmatprep.mubr.msk.f32.mxu0 %vm316_vm0, %v315_v1 }
   0x2   :  { %10 = vsyncpa [#allocation3], 0  ;;  %245 = vmatpush3.msra.mxu0 %v23_v0  ;;  %v21_v3 = vld [vmem:[%s414_s0] sm:$0xff]  ;;  %vm31_vm1 = vcmask 130048   ;;  %251 = vmatprep.subr.mxu1 %v315_v1  ;;  %v126_v4 = vld [vmem:[%s417_s3 + $0x78] sm:$0xff]  ;;  %vm204_vm2 = vcmask 64512  }
   0x3   :  { %246 = vmatprep.subr.mxu0 %v315_v1  ;;  %283 = vmatprep.mubr.msk.f32.mxu1 %vm316_vm0, %v315_v1  ;;  %v125_v5 = vld [vmem:[%s417_s3 + $0x70] sm:$0xff]  ;;  %v124_v6 = vld [vmem:[%s417_s3 + $0x68] sm:$0xff]  ;;  %v123_v7 = vld [vmem:[%s417_s3 + $0x60] sm:$0xff] }
   0x4   :  { %247 = vmatpush3.msra.mxu0 %v22_v2  ;;  %252 = vmatpush3.msra.mxu1 %v126_v4  ;;  %v122_v8 = vld [vmem:[%s417_s3 + $0x58] sm:$0xff]  ;;  %v121_v9 = vld [vmem:[%s417_s3 + $0x50] sm:$0xff]  ;;  %v120_v10 = vld [vmem:[%s417_s3 + $0x48] sm:$0xff] }
   0x5   :  { %249 = vmatmul.mubr.msk.f32.vlgmr.msra.gmra.mxu0 %vm31_vm1, %v21_v3  ;;  %253 = vmatprep.subr.mxu1 %v315_v1  ;;  %v119_v11 = vld [vmem:[%s417_s3 + $0x40] sm:$0xff]  ;;  %v118_v12 = vld [vmem:[%s417_s3 + $0x38] sm:$0xff]  ;;  %v117_v13 = vld [vmem:[%s417_s3 + $0x30] sm:$0xff] }
   0x6   :  { %254 = vmatpush3.msra.mxu1 %v125_v5  ;;  %v116_v14 = vld [vmem:[%s417_s3 + $0x28] sm:$0xff]  ;;  %v115_v15 = vld [vmem:[%s417_s3 + $0x20] sm:$0xff]  ;;  %v114_v16 = vld [vmem:[%s417_s3 + $0x18] sm:$0xff] }
   0x7   :  { %255 = vmatprep.subr.mxu1 %v315_v1  ;;  %v113_v17 = vld [vmem:[%s417_s3 + $0x10] sm:$0xff]  ;;  %v112_v18 = vld [vmem:[%s417_s3 + $0x8] sm:$0xff]  ;;  %v111_v19 = vld [vmem:[%s417_s3] sm:$0xff]  ;;  %s317_s3 = smov [#allocation2]  }
   0x8   :  { %256 = vmatpush3.msra.mxu1 %v124_v6  ;;  %v220_v20 = vld [vmem:[%s416_s2] ss:$0 sm:$0xff]  ;;  %s212_s6 = sshll.u32 %s317_s3, 4  ;;  %s213_s6 = int_to_ptr.vmem [resolvable:$true] %s212_s6 }
   0x9   :  { %257 = vmatprep.subr.mxu1 %v315_v1  ;;  %v223_v28 = vld [vmem:[%s418_s4] ss:$0 sm:$0xff]  ;;  %s293_s2 = scalar_lea.vmem %s213_s6, 128  ;;  %p298_p1 = scmp.lt.s32.totalorder %s213_s6, %s213_s6 }
   0xa   :  { %258 = vmatpush3.msra.mxu1 %v123_v7  ;;  %p294_p0 = scmp.ne.s32.totalorder %s213_s6, %s293_s2  ;;  %p299_p2 = scmp.lt.s32.totalorder %s293_s2, %s293_s2 }
   0xb   :  { %259 = vmatprep.subr.mxu1 %v315_v1 }
   0xc   :  { %260 = vmatpush3.msra.mxu1 %v122_v8  ;;  %p300_p3 = por %p299_p2, %p298_p1 }
   0xd   :  { %261 = vmatprep.subr.mxu1 %v315_v1 }
   0xe   :  { %262 = vmatpush3.msra.mxu1 %v121_v9  ;;  %p301_p4 = pnand %p300_p3, %p294_p0 }
   0xf   :  { %263 = vmatprep.subr.mxu1 %v315_v1 }
  0x10   :  { %264 = vmatpush3.msra.mxu1 %v120_v10 }
  0x11   :  { %265 = vmatprep.subr.mxu1 %v315_v1 }
  0x12   :  { %266 = vmatpush3.msra.mxu1 %v119_v11 }
  0x13   :  { %267 = vmatprep.subr.mxu1 %v315_v1 }
  0x14   :  { %268 = vmatpush3.msra.mxu1 %v118_v12 }
  0x15   :  { %269 = vmatprep.subr.mxu1 %v315_v1 }
  0x16   :  { %270 = vmatpush3.msra.mxu1 %v117_v13 }
  0x17   :  { %271 = vmatprep.subr.mxu1 %v315_v1 }
  0x18   :  { %272 = vmatpush3.msra.mxu1 %v116_v14 }
  0x19   :  { %273 = vmatprep.subr.mxu1 %v315_v1 }
  0x1a   :  { %274 = vmatpush3.msra.mxu1 %v115_v15 }
  0x1b   :  { %275 = vmatprep.subr.mxu1 %v315_v1 }
  0x1c   :  { %276 = vmatpush3.msra.mxu1 %v114_v16 }
  0x1d   :  { %277 = vmatprep.subr.mxu1 %v315_v1 }
  0x1e   :  { %278 = vmatpush3.msra.mxu1 %v113_v17 }
  0x1f   :  { %279 = vmatprep.subr.mxu1 %v315_v1 }
  0x20   :  { %280 = vmatpush3.msra.mxu1 %v112_v18 }
  0x21   :  { %281 = vmatprep.subr.mxu1 %v315_v1 }
  0x22   :  { %282 = vmatpush3.msra.mxu1 %v111_v19 }
  0xc5   :  { %v101_v21 = vpop.f32.mrf.mxu0 }
  0xc6   :  { %v102_v22 = vadd.f32 %v220_v20, %v101_v21 }
  0xc7   :  { %v250_v23 = vpop.f32.mrf.mxu0 }
  0xc8   :  { %v222_v24 = vmul.f32 -1.442695, %v102_v22 }
  0xca   :  { %289 = vpow2.f32 %v222_v24 }
  0xd7   :  { %v290_v25 = vpop.eup %289 }
  0xd8   :  { %v108_v26 = vadd.f32 1.0, %v290_v25 }
  0xda   :  { %291 = vrcp.f32 %v108_v26 }
  0xe7   :  { %v292_v27 = vpop.eup %291 }
  0xe8   :  { %284 = vmatmul.mubr.f32.vlgmr.msra.gmra.mxu1 %v292_v27 }
 0x1a8   :  { %v200_v29 = vpop.f32.mrf.mxu1 }
 0x1a9   :  { %v201_v30 = vadd.f32 %v223_v28, %v200_v29 }
 0x1aa   :  { %v285_v31 = vpop.f32.mrf.mxu1 }
 0x1ab   :  { %205 = vst.msk [vmem:[#allocation2] sm:$0xff] %vm204_vm2, %v201_v30 }
 0x1ac   :  { %304 = shalt.err (!%p301_p4)
}
 0x1ad   :  { %215 = dma.vmem_to_hbm [thread:$0]  %s213_s6, 128, %s419_s5, [#allocation3]  }
 0x1ae   :  { %313 = dma.done.wait [#allocation3], 128  }
 0x1af   :  { %314 = vsyncadd [#allocation3], 4294967168 }
 0x1b0   :  { %219 = vsyncpa [#allocation3], 1 }

</bundles_post_ra>
